<compile_context>
chip_gen: v5e
topology: v5e:2x2
jax: 0.10.0
libtpu: 0.0.40
codegen_flags: <defaults>
</compile_context>

<pallas_src>
import functools

import jax
import jax.numpy as jnp
from jax import lax
from jax.experimental import pallas as pl
from jax.experimental.pallas import tpu as pltpu

LANES = 128
SUBLANES = 8
MAX_ROW_TILE = 1024          # 1024 x 128 x 4 B = 512 KiB per f32 input tile

LOSS_NAMES = ("bce", "mse")
LOSS_WEIGHTS = (1.0, 0.5)


def _cdiv(a, b):
    return -(-a // b)


def _round_up(a, m):
    return _cdiv(a, m) * m


def _multiloss_kernel(x_ref, y_ref, out_ref, *,
                      row_tile, n_inner, n_valid, needs_mask):
    """One grid step: elementwise BCE-with-logits + squared error, reduced only
    over the sublane axis into a lane-resident (2, 128) accumulator block.

    x_ref, y_ref : (row_tile, LANES) tiles of logits / targets
    out_ref      : (1, 2, LANES) per-outer-block partial sums
                   (row 0 = BCE partials, row 1 = SE partials)
    """
    o = pl.program_id(0)           # parallel axis (per-core partial sums)
    i = pl.program_id(1)           # arbitrary (reduction) axis

    @pl.when(i == 0)
    def _init():
        out_ref[...] = jnp.zeros_like(out_ref)

    x = x_ref[...].astype(jnp.float32)
    y = y_ref[...].astype(jnp.float32)

    # Numerically stable BCE-with-logits (matches nn.BCEWithLogitsLoss):
    #   max(x, 0) - x*y + log1p(exp(-|x|))
    bce_elem = jnp.maximum(x, 0.0) - x * y + jnp.log1p(jnp.exp(-jnp.abs(x)))
    diff = x - y
    se_elem = diff * diff

    if needs_mask:
        # Zero out the zero-padded tail (int32 global index; fine for < 2^31
        # elements).
        tile_idx = o * n_inner + i
        row_ids = lax.broadcasted_iota(jnp.int32, (row_tile, LANES), 0)
        lane_ids = lax.broadcasted_iota(jnp.int32, (row_tile, LANES), 1)
        gidx = (tile_idx * row_tile + row_ids) * LANES + lane_ids
        m = (gidx < n_valid).astype(jnp.float32)
        bce_elem = bce_elem * m
        se_elem = se_elem * m

    # Sublane-axis partial sums only; the cross-lane reduce is deferred to the
    # wrapper so the steady-state loop stays off the XLU/scalar-store path.
    bce_part = jnp.sum(bce_elem, axis=0, keepdims=True)   # (1, LANES)
    mse_part = jnp.sum(se_elem, axis=0, keepdims=True)    # (1, LANES)
    out_ref[...] += jnp.concatenate([bce_part, mse_part], axis=0)[None]


@jax.jit
def multi_loss(logits, target):
    """JAX/Pallas equivalent of MultiLoss.forward for the config above."""
    assert logits.shape == target.shape
    n_elem = logits.size

    x = logits.reshape(-1)
    y = target.reshape(-1)

    rows = _cdiv(n_elem, LANES)
    if rows <= MAX_ROW_TILE:
        # Small input: one big block, grid collapses to a single step.
        row_tile = _round_up(max(rows, SUBLANES), SUBLANES)
        n_outer, n_inner = 1, 1
    else:
        row_tile = MAX_ROW_TILE
        num_tiles = _cdiv(rows, row_tile)
        # Split row-tiles across the two TensorCores on v7x (megacore via the
        # leading "parallel" axis); harmless single-core loop on v5e/v6e.
        n_outer = 2 if num_tiles >= 2 else 1
        n_inner = _cdiv(num_tiles, n_outer)

    rows_padded = n_outer * n_inner * row_tile
    n_padded = rows_padded * LANES
    needs_mask = (n_padded != n_elem)

    if needs_mask:
        pad = n_padded - n_elem
        x = jnp.pad(x, (0, pad))
        y = jnp.pad(y, (0, pad))

    x2d = x.reshape(rows_padded, LANES)
    y2d = y.reshape(rows_padded, LANES)

    kernel = functools.partial(
        _multiloss_kernel,
        row_tile=row_tile,
        n_inner=n_inner,
        n_valid=n_elem,
        needs_mask=needs_mask,
    )

    partials = pl.pallas_call(
        kernel,
        out_shape=jax.ShapeDtypeStruct((n_outer, 2, LANES), jnp.float32),
        grid_spec=pltpu.PrefetchScalarGridSpec(
            num_scalar_prefetch=0,
            grid=(n_outer, n_inner),
            in_specs=[
                pl.BlockSpec((row_tile, LANES),
                             lambda o, i: (o * n_inner + i, 0)),
                pl.BlockSpec((row_tile, LANES),
                             lambda o, i: (o * n_inner + i, 0)),
            ],
            out_specs=pl.BlockSpec((1, 2, LANES), lambda o, i: (o, 0, 0)),
        ),
        compiler_params=pltpu.CompilerParams(
            dimension_semantics=("parallel", "arbitrary"),
            # 2 inputs x 2 buffers x 512 KiB tile ~= 2 MiB -> plenty of
            # headroom on every generation (v7x physical VMEM is 64 MiB).
            vmem_limit_bytes=32 * 1024 * 1024,
        ),
    )(x2d, y2d)

    # Tiny final cross-lane / cross-core reduction + mean + weights in JAX.
    inv_n = jnp.float32(1.0 / n_elem)
    bce_mean = jnp.sum(partials[:, 0, :]) * inv_n
    mse_mean = jnp.sum(partials[:, 1, :]) * inv_n

    losses = {
        LOSS_NAMES[0]: bce_mean * jnp.float32(LOSS_WEIGHTS[0]),
        LOSS_NAMES[1]: mse_mean * jnp.float32(LOSS_WEIGHTS[1]),
    }
    losses["loss"] = losses[LOSS_NAMES[0]] + losses[LOSS_NAMES[1]]
    return losses


def _reference(logits, target):
    x = logits.astype(jnp.float32)
    y = target.astype(jnp.float32)
    bce = jnp.mean(jnp.maximum(x, 0.0) - x * y + jnp.log1p(jnp.exp(-jnp.abs(x))))
    mse = jnp.mean((x - y) ** 2)
    return {"bce": bce * LOSS_WEIGHTS[0], "mse": mse * LOSS_WEIGHTS[1],
            "loss": bce * LOSS_WEIGHTS[0] + mse * LOSS_WEIGHTS[1]}


if __name__ == "__main__":
    key = jax.random.PRNGKey(0)
    k1, k2, k3, k4 = jax.random.split(key, 4)

    # NCHW logits (as the PyTorch module would receive), targets in [0, 1].
    logits = jax.random.normal(k1, (2, 4, 16, 16), dtype=jnp.float32)
    target = jax.random.uniform(k2, (2, 4, 16, 16), dtype=jnp.float32)

    out = multi_loss(logits, target)
    jax.block_until_ready(out)

    ref = _reference(logits, target)
    for k in ("bce", "mse", "loss"):
        assert jnp.allclose(out[k], ref[k], rtol=1e-5, atol=1e-5), (
            k, out[k], ref[k])

    # Also exercise the padded / masked path with a non-lane-aligned shape.
    logits2 = jax.random.normal(k3, (3, 5, 7, 11), dtype=jnp.float32)
    target2 = jax.random.uniform(k4, (3, 5, 7, 11), dtype=jnp.float32)
    out2 = multi_loss(logits2, target2)
    jax.block_until_ready(out2)
    ref2 = _reference(logits2, target2)
    for k in ("bce", "mse", "loss"):
        assert jnp.allclose(out2[k], ref2[k], rtol=1e-5, atol=1e-5), (
            k, out2[k], ref2[k])

    print("KERNEL_OK")
</pallas_src>

<mosaic_0001>
module attributes {stable_mosaic.version = 11 : i64} {
  func.func @_multiloss_kernel(%arg0: i32, %arg1: i32, %arg2: memref<16x128xf32, #tpu.memory_space<vmem>>, %arg3: memref<16x128xf32, #tpu.memory_space<vmem>>, %arg4: memref<1x2x128xf32, #tpu.memory_space<vmem>>) attributes {dimension_semantics = [#tpu.dimension_semantics<parallel>, #tpu.dimension_semantics<arbitrary>], iteration_bounds = array<i64: 1, 1>, scalar_prefetch = 0 : i64, scratch_operands = 0 : i64, tpu.core_type = #tpu.core_type<tc>, window_params = [{transform_indices = @transform_0, window_bounds = array<i64: 16, 128>}, {transform_indices = @transform_1, window_bounds = array<i64: 16, 128>}, {transform_indices = @transform_2, window_bounds = array<i64: 1, 2, 128>}]} {
    %c0_i32 = arith.constant 0 : i32
    %0 = arith.cmpi eq, %arg1, %c0_i32 : i32
    %1 = arith.extui %0 : i1 to i32
    %c0_i32_0 = arith.constant 0 : i32
    %2 = arith.cmpi ne, %1, %c0_i32_0 : i32
    scf.if %2 {
      %cst_13 = arith.constant 0.000000e+00 : f32
      %26 = vector.broadcast %cst_13 : f32 to vector<1x2x128xf32>
      %c0_14 = arith.constant 0 : index
      %c0_15 = arith.constant 0 : index
      %c0_16 = arith.constant 0 : index
      %27 = vector.load %arg4[%c0_14, %c0_15, %c0_16] : memref<1x2x128xf32, #tpu.memory_space<vmem>>, vector<1x2x128xf32>
      tpu.vector_store %arg4[%c0_14, %c0_15, %c0_16], %26 {strides = array<i32>} : memref<1x2x128xf32, #tpu.memory_space<vmem>>, vector<1x2x128xf32>,
    } else {
    }
    %c0 = arith.constant 0 : index
    %c0_1 = arith.constant 0 : index
    %3 = vector.load %arg2[%c0, %c0_1] : memref<16x128xf32, #tpu.memory_space<vmem>>, vector<16x128xf32>
    %c0_2 = arith.constant 0 : index
    %c0_3 = arith.constant 0 : index
    %4 = vector.load %arg3[%c0_2, %c0_3] : memref<16x128xf32, #tpu.memory_space<vmem>>, vector<16x128xf32>
    %cst = arith.constant 0.000000e+00 : f32
    %5 = vector.broadcast %cst : f32 to vector<16x128xf32>
    %6 = arith.maximumf %3, %5 : vector<16x128xf32>
    %7 = arith.mulf %3, %4 : vector<16x128xf32>
    %8 = arith.subf %6, %7 : vector<16x128xf32>
    %9 = math.absf %3 : vector<16x128xf32>
    %cst_4 = arith.constant 0.000000e+00 : f32
    %10 = vector.broadcast %cst_4 : f32 to vector<16x128xf32>
    %11 = arith.subf %10, %9 : vector<16x128xf32>
    %12 = math.exp %11 : vector<16x128xf32>
    %13 = math.log1p %12 : vector<16x128xf32>
    %14 = arith.addf %8, %13 : vector<16x128xf32>
    %15 = arith.subf %3, %4 : vector<16x128xf32>
    %16 = arith.mulf %15, %15 : vector<16x128xf32>
    %cst_5 = arith.constant dense<0.000000e+00> : vector<128xf32>
    %17 = vector.multi_reduction <add>, %14, %cst_5 [0] : vector<16x128xf32> to vector<128xf32>
    %18 = vector.shape_cast %17 : vector<128xf32> to vector<1x128xf32>
    %cst_6 = arith.constant dense<0.000000e+00> : vector<128xf32>
    %19 = vector.multi_reduction <add>, %16, %cst_6 [0] : vector<16x128xf32> to vector<128xf32>
    %20 = vector.shape_cast %19 : vector<128xf32> to vector<1x128xf32>
    %c0_7 = arith.constant 0 : index
    %c0_8 = arith.constant 0 : index
    %c0_9 = arith.constant 0 : index
    %21 = vector.load %arg4[%c0_7, %c0_8, %c0_9] : memref<1x2x128xf32, #tpu.memory_space<vmem>>, vector<1x2x128xf32>
    %22 = tpu.concatenate %18, %20 in 0 : vector<1x128xf32>, vector<1x128xf32> -> vector<2x128xf32>
    %23 = vector.shape_cast %22 : vector<2x128xf32> to vector<1x2x128xf32>
    %24 = arith.addf %21, %23 : vector<1x2x128xf32>
    %c0_10 = arith.constant 0 : index
    %c0_11 = arith.constant 0 : index
    %c0_12 = arith.constant 0 : index
    %25 = vector.load %arg4[%c0_10, %c0_11, %c0_12] : memref<1x2x128xf32, #tpu.memory_space<vmem>>, vector<1x2x128xf32>
    tpu.vector_store %arg4[%c0_10, %c0_11, %c0_12], %24 {strides = array<i32>} : memref<1x2x128xf32, #tpu.memory_space<vmem>>, vector<1x2x128xf32>,
    return
  }
  func.func @transform_0(%arg0: i32, %arg1: i32) -> (i32, i32) {
    %c1_i32 = arith.constant 1 : i32
    %0 = arith.muli %arg0, %c1_i32 : i32
    %1 = arith.addi %0, %arg1 : i32
    %c0_i32 = arith.constant 0 : i32
    %c0_i32_0 = arith.constant 0 : i32
    return %1, %c0_i32 : i32, i32
  }
  func.func @transform_1(%arg0: i32, %arg1: i32) -> (i32, i32) {
    %c1_i32 = arith.constant 1 : i32
    %0 = arith.muli %arg0, %c1_i32 : i32
    %1 = arith.addi %0, %arg1 : i32
    %c0_i32 = arith.constant 0 : i32
    %c0_i32_0 = arith.constant 0 : i32
    return %1, %c0_i32 : i32, i32
  }
  func.func @transform_2(%arg0: i32, %arg1: i32) -> (i32, i32, i32) {
    %c0_i32 = arith.constant 0 : i32
    %c0_i32_0 = arith.constant 0 : i32
    %c0_i32_1 = arith.constant 0 : i32
    return %arg0, %c0_i32, %c0_i32_0 : i32, i32, i32
  }
}

</mosaic_0001>

<bundles_post_ra>
// kernel: multi_loss.1
= control target key start
LH: loop header
LB: loop body
LE: loop exit
PB: predicated region body
PF: predicated region fallthrough
CT: control target
= control target key end

     0   :  { %v146_v0 = vmov 0.0   ;;  %vm117_vm2 = vcmask 1040384   ;;  %s183_s2 = inlined_call_operand.vmem [shape: f32[1,2,128], index: 2, kind: output, shape index: {}]   ;;  %s184_s0 = inlined_call_operand.vmem [shape: f32[16,128], index: 0, kind: input, shape index: {}]   ;;  %s185_s1 = inlined_call_operand.vmem [shape: f32[16,128], index: 1, kind: input, shape index: {}]  }
   0x1   :  { %59 = vst [vmem:[%s183_s2] sm:$0x3] %v146_v0  ;;  %v60_v1 = vld [vmem:[%s184_s0] sm:$0xff]  ;;  %v61_v2 = vld [vmem:[%s184_s0 + $0x8] sm:$0xff] }
   0x2   :  { %v70_v3 = vand.u32 2147483647, %v60_v1  ;;  %v71_v4 = vand.u32 2147483647, %v61_v2  ;;  %v62_v8 = vld [vmem:[%s185_s1] sm:$0xff]  ;;  %v63_v9 = vld [vmem:[%s185_s1 + $0x8] sm:$0xff] }
   0x3   :  { %v98_v11 = vsub.f32 %v60_v1, %v62_v8  ;;  %v99_v12 = vsub.f32 %v61_v2, %v63_v9  ;;  %v64_v23 = vmax.f32 %v60_v1, 0.0  ;;  %v66_v24 = vmul.f32 %v62_v8, %v60_v1 }
   0x4   :  { %v72_v5 = vsub.f32 0.0, %v70_v3  ;;  %v73_v6 = vsub.f32 0.0, %v71_v4  ;;  %v65_v27 = vmax.f32 %v61_v2, 0.0  ;;  %v67_v28 = vmul.f32 %v63_v9, %v61_v2 }
   0x5   :  { %v100_v13 = vmul.f32 %v98_v11, %v98_v11  ;;  %v101_v14 = vmul.f32 %v99_v12, %v99_v12  ;;  %v68_v33 = vsub.f32 %v64_v23, %v66_v24 }
   0x6   :  { %v74_v7 = vmul.f32 1.442695, %v72_v5  ;;  %v76_v10 = vmul.f32 1.442695, %v73_v6  ;;  %v69_v36 = vsub.f32 %v65_v27, %v67_v28 }
   0x7   :  { %v109_v21 = vadd.f32 %v101_v14, %v100_v13 }
   0x8   :  { %138 = vpow2.f32 %v74_v7  ;;  %v116_v55 = vld [vmem:[%s183_s2] sm:$0x3] }
   0x9   :  { %140 = vpow2.f32 %v76_v10  ;;  %v110_v30 = vrot.slane %v109_v21, 4 }
   0xb   :  { %v111_v38 = vadd.f32 %v110_v30, %v109_v21 }
   0xd   :  { %v112_v44 = vrot.slane %v111_v38, 2 }
   0xe   :  { %v139_v15 = vpop.eup %138 }
   0xf   :  { %v141_v16 = vpop.eup %140  ;;  %v78_v17 = vadd.f32 1.0, %v139_v15  ;;  %v81_v18 = vmul.f32 -0.5, %v139_v15  ;;  %v84_v25 = vand.u32 2147483647, %v139_v15  ;;  %v113_v47 = vadd.f32 %v112_v44, %v111_v38 }
  0x10   :  { %v87_v19 = vadd.f32 1.0, %v141_v16  ;;  %v90_v20 = vmul.f32 -0.5, %v141_v16  ;;  %v93_v29 = vand.u32 2147483647, %v141_v16 }
  0x11   :  { %142 = vlog2.f32 %v78_v17  ;;  %v82_v22 = vadd.f32 1.0, %v81_v18  ;;  %vm85_vm0 = vcmp.lt.f32.partialorder %v84_v25, 0.0004427343  ;;  %v114_v50 = vrot.slane %v113_v47, 1 }
  0x12   :  { %144 = vlog2.f32 %v87_v19  ;;  %v91_v26 = vadd.f32 1.0, %v90_v20  ;;  %vm94_vm1 = vcmp.lt.f32.partialorder %v93_v29, 0.0004427343 }
  0x13   :  { %v83_v31 = vmul.f32 %v139_v15, %v82_v22  ;;  %v115_v53 = vadd.f32 %v114_v50, %v113_v47 }
  0x14   :  { %v92_v34 = vmul.f32 %v141_v16, %v91_v26 }
  0x17   :  { %v143_v32 = vpop.eup %142 }
  0x18   :  { %v145_v35 = vpop.eup %144  ;;  %v80_v37 = vmul.f32 0.6931472, %v143_v32 }
  0x19   :  { %v89_v39 = vmul.f32 0.6931472, %v145_v35 }
  0x1a   :  { %v86_v40 = vsel %vm85_vm0, %v83_v31, %v80_v37 }
  0x1b   :  { %v95_v41 = vsel %vm94_vm1, %v92_v34, %v89_v39  ;;  %v96_v42 = vadd.f32 %v86_v40, %v68_v33 }
  0x1c   :  { %v97_v43 = vadd.f32 %v95_v41, %v69_v36 }
  0x1e   :  { %v102_v45 = vadd.f32 %v97_v43, %v96_v42 }
  0x20   :  { %v103_v46 = vrot.slane %v102_v45, 4 }
  0x22   :  { %v104_v48 = vadd.f32 %v103_v46, %v102_v45 }
  0x24   :  { %v105_v49 = vrot.slane %v104_v48, 2 }
  0x26   :  { %v106_v51 = vadd.f32 %v105_v49, %v104_v48 }
  0x28   :  { %v107_v52 = vrot.slane %v106_v51, 1 }
  0x2a   :  { %v108_v54 = vadd.f32 %v107_v52, %v106_v51 }
  0x2c   :  { %v118_v56 = vsel %vm117_vm2, %v108_v54, %v115_v53 }
  0x2d   :  { %v119_v57 = vadd.f32 %v118_v56, %v116_v55 }
  0x2f   :  { %120 = vst [vmem:[%s183_s2] sm:$0x3] %v119_v57 }

</bundles_post_ra>
